<compile_context>
chip_gen: v7x
topology: tpu7x:2x2x1
jax: 0.10.0
libtpu: 0.0.40
codegen_flags: <defaults>
</compile_context>

<pallas_src>
import math

import jax
import jax.numpy as jnp
from jax.experimental import pallas as pl
from jax.experimental.pallas import tpu as pltpu

NEG_SLOPE = 0.01   # torch.nn.functional.leaky_relu default negative_slope

TM = 256           # output row tile (MXU 256x256-aligned on v6e/v7x; multiple of 128 for v5e)
TK = 256           # contraction (source-node) tile; lane dim of A blocks
F_LANE = 128       # feature padding multiple -> lane-dense stores


def _round_up(x, m):
    return (x + m - 1) // m * m


def _lcm(a, b):
    return a * b // math.gcd(a, b)


# ---------------------------------------------------------------------------
# Kernel 1: feature transform  H = X @ W^T   (bf16 inputs to MXU, f32 accumulate)
# ---------------------------------------------------------------------------
def _feat_kernel(x_ref, wt_ref, o_ref):
    h = jnp.dot(
        x_ref[...].astype(jnp.bfloat16),
        wt_ref[...],
        preferred_element_type=jnp.float32,
    )
    o_ref[...] = h.astype(o_ref.dtype)


def feature_transform(x_pad, wt_pad):
    """x_pad: [n_pad, f_in_pad] f32, wt_pad: [f_in_pad, f_out_pad] bf16 -> [n_pad, f_out_pad] bf16."""
    n_pad, f_in_pad = x_pad.shape
    f_out_pad = wt_pad.shape[1]
    cost = pl.CostEstimate(
        flops=int(2 * n_pad * f_in_pad * f_out_pad),
        transcendentals=0,
        bytes_accessed=int(
            x_pad.size * x_pad.dtype.itemsize + wt_pad.size * 2 + n_pad * f_out_pad * 2
        ),
    )
    return pl.pallas_call(
        _feat_kernel,
        out_shape=jax.ShapeDtypeStruct((n_pad, f_out_pad), jnp.bfloat16),
        grid=(n_pad // TM,),
        in_specs=[
            pl.BlockSpec((TM, f_in_pad), lambda i: (i, 0)),
            pl.BlockSpec((f_in_pad, f_out_pad), lambda i: (0, 0)),
        ],
        out_specs=pl.BlockSpec((TM, f_out_pad), lambda i: (i, 0)),
        compiler_params=pltpu.CompilerParams(dimension_semantics=("parallel",)),
        cost_estimate=cost,
    )(x_pad, wt_pad)


# ---------------------------------------------------------------------------
# Kernel 2: aggregation + activation   out = leaky_relu(A @ H)
# Tiled accumulator: output tile resident across the contraction (k) axis.
# ---------------------------------------------------------------------------
def _agg_kernel(a_ref, h_ref, o_ref, acc_ref):
    k = pl.program_id(1)

    @pl.when(k == 0)
    def _():
        acc_ref[...] = jnp.zeros_like(acc_ref)

    acc_ref[...] += jnp.dot(
        a_ref[...], h_ref[...], preferred_element_type=jnp.float32
    )

    @pl.when(k == pl.num_programs(1) - 1)
    def _():
        v = acc_ref[...]
        o_ref[...] = jnp.where(v >= 0.0, v, NEG_SLOPE * v).astype(o_ref.dtype)


def aggregate_leaky_relu(a_pad, h_pad):
    """a_pad: [n_pad, n_pad] bf16, h_pad: [n_pad, f_out_pad] bf16 -> [n_pad, f_out_pad] f32."""
    n_pad = a_pad.shape[0]
    f_out_pad = h_pad.shape[1]
    cost = pl.CostEstimate(
        flops=int(2 * n_pad * n_pad * f_out_pad),
        transcendentals=0,
        bytes_accessed=int(a_pad.size * 2 + h_pad.size * 2 + n_pad * f_out_pad * 4),
    )
    return pl.pallas_call(
        _agg_kernel,
        out_shape=jax.ShapeDtypeStruct((n_pad, f_out_pad), jnp.float32),
        grid=(n_pad // TM, n_pad // TK),
        in_specs=[
            pl.BlockSpec((TM, TK), lambda i, k: (i, k)),          # A row/col tile
            pl.BlockSpec((TK, f_out_pad), lambda i, k: (k, 0)),   # H source tile
        ],
        out_specs=pl.BlockSpec((TM, f_out_pad), lambda i, k: (i, 0)),
        scratch_shapes=[pltpu.VMEM((TM, f_out_pad), jnp.float32)],
        compiler_params=pltpu.CompilerParams(
            dimension_semantics=("parallel", "arbitrary")
        ),
        cost_estimate=cost,
    )(a_pad, h_pad)


# ---------------------------------------------------------------------------
# Glue: gcn_norm (torch_geometric gcn_norm with add_self_loops=False,
# improved=False, flow source->target), densified + zero-padded to [n_pad, n_pad].
# TODO(synk): for large sparse graphs a block-sparse / scalar-prefetch formulation
#             (skipping all-zero A tiles) should replace this dense path.
# ---------------------------------------------------------------------------
def gcn_norm_dense_padded(edge_index, edge_weight, num_nodes, n_pad):
    row = edge_index[0]  # source
    col = edge_index[1]  # target
    ew = edge_weight.astype(jnp.float32)
    deg = jnp.zeros((num_nodes,), jnp.float32).at[col].add(ew)
    deg_inv_sqrt = jnp.where(deg > 0.0, jax.lax.rsqrt(deg), 0.0)
    norm = deg_inv_sqrt[row] * ew * deg_inv_sqrt[col]
    # out[col] += norm * x[row]  =>  A[col, row] = norm
    a = jnp.zeros((n_pad, n_pad), jnp.float32).at[col, row].add(norm)
    return a.astype(jnp.bfloat16)


# ---------------------------------------------------------------------------
# GNN forward (model_type='kcn'): per layer -> feature transform kernel, then
# fused aggregation + leaky_relu kernel. Dropout is identity (eval semantics).
# TODO(synk): training-mode dropout (p=args.dropout) not implemented; eval semantics used.
# TODO(synk): for moderate N, A could be kept resident in VMEM across layers in one
#             multi-layer pallas_call to avoid re-streaming A from HBM per layer.
# ---------------------------------------------------------------------------
def gnn_forward(x, edge_index, edge_weight, layer_weights):
    n, f_in = x.shape
    n_pad = _round_up(max(n, 1), _lcm(TM, TK))

    a_pad = gcn_norm_dense_padded(edge_index, edge_weight, n, n_pad)

    # Zero-pad node features to [n_pad, f_in_pad] (padded rows/cols stay zero everywhere).
    f_in_pad = _round_up(f_in, F_LANE)
    h = jnp.zeros((n_pad, f_in_pad), jnp.float32).at[:n, :f_in].set(
        x.astype(jnp.float32)
    )

    f_out_last = f_in
    for w in layer_weights:
        f_out, f_in_w = w.shape
        f_in_pad_w = _round_up(f_in_w, F_LANE)
        f_out_pad = _round_up(f_out, F_LANE)
        assert h.shape[1] == f_in_pad_w, "layer dims must chain"
        wt_pad = (
            jnp.zeros((f_in_pad_w, f_out_pad), jnp.float32)
            .at[:f_in_w, :f_out]
            .set(jnp.asarray(w, jnp.float32).T)
            .astype(jnp.bfloat16)
        )
        hw = feature_transform(h, wt_pad)       # [n_pad, f_out_pad] bf16
        h = aggregate_leaky_relu(a_pad, hw)     # [n_pad, f_out_pad] f32
        f_out_last = f_out

    return h[:n, :f_out_last]


# ---------------------------------------------------------------------------
# Deterministic parameter init (glorot, as PyG's Linear default for GCNConv).
# ---------------------------------------------------------------------------
def init_weights(input_dim, hidden_sizes, seed=42):
    dims = [input_dim] + list(hidden_sizes)
    weights = []
    key = jax.random.PRNGKey(seed)
    for i in range(len(hidden_sizes)):
        key, sub = jax.random.split(key)
        fan_in, fan_out = dims[i], dims[i + 1]
        limit = (6.0 / (fan_in + fan_out)) ** 0.5
        w = jax.random.uniform(sub, (fan_out, fan_in), jnp.float32, -limit, limit)
        weights.append(w)
    return weights


if __name__ == "__main__":
    # Small synthetic graph consistent with the module's forward:
    # x: [N, input_dim], edge_index: [2, E], edge_weight: [E]
    N = 8
    INPUT_DIM = 4
    HIDDEN_SIZES = [32, 32]
    E = 16

    key = jax.random.PRNGKey(0)
    k_x, k_src, k_dst, k_ew = jax.random.split(key, 4)

    x = jax.random.normal(k_x, (N, INPUT_DIM), jnp.float32)
    src = jax.random.randint(k_src, (E,), 0, N)
    dst = jax.random.randint(k_dst, (E,), 0, N)
    edge_index = jnp.stack([src, dst], axis=0)           # [2, E]
    edge_weight = jax.random.uniform(k_ew, (E,), jnp.float32, 0.1, 1.0)

    layer_weights = init_weights(INPUT_DIM, HIDDEN_SIZES, seed=42)

    out = gnn_forward(x, edge_index, edge_weight, layer_weights)
    out = jax.block_until_ready(out)
    assert out.shape == (N, HIDDEN_SIZES[-1])
    assert jnp.all(jnp.isfinite(out))
    print("KERNEL_OK")
</pallas_src>

<mosaic_0001>
module attributes {stable_mosaic.version = 11 : i64} {
  func.func @_feat_kernel(%arg0: i32, %arg1: memref<256x128xf32, #tpu.memory_space<vmem>>, %arg2: memref<128x128xbf16, #tpu.memory_space<vmem>>, %arg3: memref<256x128xbf16, #tpu.memory_space<vmem>>) attributes {dimension_semantics = [#tpu.dimension_semantics<parallel>], iteration_bounds = array<i64: 1>, scalar_prefetch = 0 : i64, scratch_operands = 0 : i64, tpu.core_type = #tpu.core_type<tc>, window_params = [{transform_indices = @transform_0, window_bounds = array<i64: 256, 128>}, {pipeline_mode = #tpu.pipeline_mode<synchronous>, transform_indices = @transform_1, window_bounds = array<i64: 128, 128>}, {transform_indices = @transform_2, window_bounds = array<i64: 256, 128>}]} {
    %c0 = arith.constant 0 : index
    %c0_0 = arith.constant 0 : index
    %0 = vector.load %arg1[%c0, %c0_0] : memref<256x128xf32, #tpu.memory_space<vmem>>, vector<256x128xf32>
    %1 = arith.truncf %0 : vector<256x128xf32> to vector<256x128xbf16>
    %c0_1 = arith.constant 0 : index
    %c0_2 = arith.constant 0 : index
    %2 = vector.load %arg2[%c0_1, %c0_2] : memref<128x128xbf16, #tpu.memory_space<vmem>>, vector<128x128xbf16>
    %cst = arith.constant dense<0.000000e+00> : vector<256x128xf32>
    %3 = tpu.matmul %1, %2, %cst {dimension_numbers = #tpu.dot_dimension_numbers<[1], [0], [0], [1], [0, 0, 1, 1], [], []>} : vector<256x128xbf16>, vector<128x128xbf16>, vector<256x128xf32> -> vector<256x128xf32>
    %4 = arith.truncf %3 : vector<256x128xf32> to vector<256x128xbf16>
    %c0_3 = arith.constant 0 : index
    %c0_4 = arith.constant 0 : index
    %5 = vector.load %arg3[%c0_3, %c0_4] : memref<256x128xbf16, #tpu.memory_space<vmem>>, vector<256x128xbf16>
    tpu.vector_store %arg3[%c0_3, %c0_4], %4 {strides = array<i32>} : memref<256x128xbf16, #tpu.memory_space<vmem>>, vector<256x128xbf16>,
    return
  }
  func.func @transform_0(%arg0: i32) -> (i32, i32) {
    %c0_i32 = arith.constant 0 : i32
    %c0_i32_0 = arith.constant 0 : i32
    return %arg0, %c0_i32 : i32, i32
  }
  func.func @transform_1(%arg0: i32) -> (i32, i32) {
    %c0_i32 = arith.constant 0 : i32
    %c0_i32_0 = arith.constant 0 : i32
    %c0_i32_1 = arith.constant 0 : i32
    return %c0_i32, %c0_i32_0 : i32, i32
  }
  func.func @transform_2(%arg0: i32) -> (i32, i32) {
    %c0_i32 = arith.constant 0 : i32
    %c0_i32_0 = arith.constant 0 : i32
    return %arg0, %c0_i32 : i32, i32
  }
}

</mosaic_0001>

<bundles_post_ra>
// kernel: tpu_custom_call.1
= control target key start
LH: loop header
LB: loop body
LE: loop exit
PB: predicated region body
PF: predicated region fallthrough
CT: control target
= control target key end

     0   :  { %7 = vsyncpa [#allocation3], 0  ;;  %s898_s0 = inlined_call_operand.hbm [shape: f32[256,128], index: 0, kind: input, shape index: {}]   ;;  %s899_s1 = inlined_call_operand.hbm [shape: bf16[128,128], index: 1, kind: input, shape index: {}]   ;;  %s900_s2 = inlined_call_operand.hbm [shape: bf16[256,128], index: 2, kind: output, shape index: {}]  }
   0x1   :  { %8 = vsyncpa [#allocation6], 0 }
   0x2   :  { %9 = vsyncpa [#allocation4], 0  ;;  %s834_s9 = smov [#allocation2]   ;;  %s762_s13 = scalar_lea.hbm %s898_s0, 4096 }
   0x3   :  { %s15_s10 = sshll.u32 %s834_s9, 4  ;;  %p763_p0 = scmp.ne.s32.totalorder %s898_s0, %s762_s13  ;;  %s16_s10 = int_to_ptr.vmem [resolvable:$true] %s15_s10 }
   0x4   :  { %p766_p1 = scmp.lt.u32.totalorder %s762_s13, %s898_s0 }
   0x6   :  { %p768_p2 = pnand %p766_p1, %p763_p0 }
   0x8   :  { %771 = shalt.err (!%p768_p2)
}
   0x9   :  { %s772_s18 = scalar_lea.vmem %s16_s10, 4096  ;;  %p777_p4 = scmp.lt.s32.totalorder %s16_s10, %s16_s10 }
   0xa   :  { %p773_p3 = scmp.ne.s32.totalorder %s16_s10, %s772_s18  ;;  %p778_p5 = scmp.lt.s32.totalorder %s772_s18, %s772_s18 }
   0xc   :  { %p779_p6 = por %p778_p5, %p777_p4 }
   0xe   :  { %p780_p7 = pnand %p779_p6, %p773_p3 }
  0x10   :  { %783 = shalt.err (!%p780_p7)
}
  0x11   :  { %s835_s19 = smov 128   ;;  %s836_s20 = smov 8  }
  0x12   :  { %21 = dma.hbm_to_vmem [thread:$0]  %s898_s0, 4096, %s16_s10, [#allocation3], %s835_s19, %s835_s19, %s836_s20  }
  0x13   :  { %s837_s23 = smov [#allocation5]   ;;  %s784_s27 = scalar_lea.hbm %s899_s1, 1024 }
  0x14   :  { %s27_s24 = sshll.u32 %s837_s23, 4  ;;  %p785_p8 = scmp.ne.s32.totalorder %s899_s1, %s784_s27  ;;  %s28_s24 = int_to_ptr.vmem [resolvable:$true] %s27_s24 }
  0x15   :  { %p788_p9 = scmp.lt.u32.totalorder %s784_s27, %s899_s1 }
  0x17   :  { %p790_p10 = pnand %p788_p9, %p785_p8 }
  0x19   :  { %793 = shalt.err (!%p790_p10)
}
  0x1a   :  { %s794_s4 = scalar_lea.vmem %s28_s24, 1024  ;;  %p799_p12 = scmp.lt.s32.totalorder %s28_s24, %s28_s24 }
  0x1b   :  { %p795_p11 = scmp.ne.s32.totalorder %s28_s24, %s794_s4  ;;  %p800_p13 = scmp.lt.s32.totalorder %s794_s4, %s794_s4 }
  0x1d   :  { %p801_p0 = por %p800_p13, %p799_p12 }
  0x1f   :  { %p802_p1 = pnand %p801_p0, %p795_p11 }
  0x21   :  { %805 = shalt.err (!%p802_p1)
}
  0x22   :  { %s838_s0 = smov 64   ;;  %s839_s5 = smov 4  }
  0x23   :  { %33 = dma.hbm_to_vmem [thread:$0]  %s899_s1, 1024, %s28_s24, [#allocation6], %s838_s0, %s838_s0, %s839_s5  }
  0x24   :  { %828 = dma.done.wait [#allocation3], 4096  }
  0x25   :  { %829 = vsyncadd [#allocation3], 4294963200 }
  0x26   :  { %830 = dma.done.wait [#allocation6], 1024  }
  0x27   :  { %831 = vsyncadd [#allocation6], 4294966272  ;;  %v754_v0 = vld [vmem:[#allocation5] sm:$0xff]   ;;  %v755_v1 = vld [vmem:[#allocation5 + $0x8] sm:$0xff]   ;;  %s840_s1 = smov [#allocation7]  }
  0x28   :  { %683 = vmatprep.subr.bf16.mxu0 %v754_v0  ;;  %731 = vmatprep.subr.bf16.mxu1 %v754_v0  ;;  %v756_v2 = vld [vmem:[#allocation5 + $0x10] sm:$0xff]   ;;  %v757_v3 = vld [vmem:[#allocation5 + $0x18] sm:$0xff]   ;;  %v41_v4 = vld [vmem:[#allocation2] sm:$0xff]  ;;  %s479_s8 = sshll.u32 %s840_s1, 4  ;;  %s480_s8 = int_to_ptr.vmem [resolvable:$true] %s479_s8 }
  0x29   :  { %684 = vmatpush3.bf16.msra.mxu0 %v754_v0  ;;  %739 = vmatpush3.bf16.msra.mxu1 %v754_v0  ;;  %v42_v5 = vld [vmem:[#allocation2 + $0x8] sm:$0xff]  ;;  %v57_v6 = vld [vmem:[#allocation2 + $0x80] sm:$0xff]  ;;  %v760_v12 = vld [vmem:[#allocation5 + $0x30] sm:$0xff]   ;;  %s806_s9 = scalar_lea.vmem %s480_s8, 2048  ;;  %p811_p3 = scmp.lt.s32.totalorder %s480_s8, %s480_s8 }
  0x2a   :  { %685 = vmatprep.subr.bf16.mxu0 %v755_v1  ;;  %732 = vmatprep.subr.bf16.mxu1 %v755_v1  ;;  %v73_v7 = vpack.c.bf16 %v42_v5, %v41_v4  ;;  %v58_v8 = vld [vmem:[#allocation2 + $0x88] sm:$0xff]  ;;  %v758_v10 = vld [vmem:[#allocation5 + $0x20] sm:$0xff]   ;;  %v761_v13 = vld [vmem:[#allocation5 + $0x38] sm:$0xff]   ;;  %p807_p2 = scmp.ne.s32.totalorder %s480_s8, %s806_s9  ;;  %p812_p4 = scmp.lt.s32.totalorder %s806_s9, %s806_s9 }
  0x2b   :  { %v81_v9 = vpack.c.bf16 %v58_v8, %v57_v6  ;;  %v759_v11 = vld [vmem:[#allocation5 + $0x28] sm:$0xff]   ;;  %v43_v14 = vld [vmem:[#allocation2 + $0x10] sm:$0xff]  ;;  %v44_v15 = vld [vmem:[#allocation2 + $0x18] sm:$0xff] }
  0x2c   :  { %699 = vmatprep.mubr.bf16.mxu0 %v73_v7  ;;  %v59_v16 = vld [vmem:[#allocation2 + $0x90] sm:$0xff]  ;;  %v60_v17 = vld [vmem:[#allocation2 + $0x98] sm:$0xff]  ;;  %v45_v18 = vld [vmem:[#allocation2 + $0x20] sm:$0xff]  ;;  %v74_v22 = vpack.c.bf16 %v44_v15, %v43_v14  ;;  %p813_p5 = por %p812_p4, %p811_p3 }
  0x2d   :  { %686 = vmatpush3.bf16.msra.mxu0 %v755_v1  ;;  %740 = vmatpush3.bf16.msra.mxu1 %v755_v1  ;;  %v46_v19 = vld [vmem:[#allocation2 + $0x28] sm:$0xff]  ;;  %v61_v20 = vld [vmem:[#allocation2 + $0xa0] sm:$0xff]  ;;  %v82_v23 = vpack.c.bf16 %v60_v17, %v59_v16  ;;  %v47_v26 = vld [vmem:[#allocation2 + $0x30] sm:$0xff] }
  0x2e   :  { %687 = vmatprep.subr.bf16.mxu0 %v756_v2  ;;  %733 = vmatprep.subr.bf16.mxu1 %v756_v2  ;;  %v62_v21 = vld [vmem:[#allocation2 + $0xa8] sm:$0xff]  ;;  %v75_v24 = vpack.c.bf16 %v46_v19, %v45_v18  ;;  %v48_v27 = vld [vmem:[#allocation2 + $0x38] sm:$0xff]  ;;  %v63_v28 = vld [vmem:[#allocation2 + $0xb0] sm:$0xff]  ;;  %p814_p6 = pnand %p813_p5, %p807_p2 }
  0x2f   :  { %715 = vmatprep.mubr.bf16.mxu1 %v81_v9  ;;  %v83_v25 = vpack.c.bf16 %v62_v21, %v61_v20  ;;  %v64_v29 = vld [vmem:[#allocation2 + $0xb8] sm:$0xff]  ;;  %v49_v30 = vld [vmem:[#allocation2 + $0x40] sm:$0xff]  ;;  %v50_v31 = vld [vmem:[#allocation2 + $0x48] sm:$0xff]  ;;  %v76_v34 = vpack.c.bf16 %v48_v27, %v47_v26 }
  0x30   :  { %v65_v32 = vld [vmem:[#allocation2 + $0xc0] sm:$0xff]  ;;  %v66_v33 = vld [vmem:[#allocation2 + $0xc8] sm:$0xff]  ;;  %v84_v35 = vpack.c.bf16 %v64_v29, %v63_v28  ;;  %v77_v36 = vpack.c.bf16 %v50_v31, %v49_v30  ;;  %v51_v38 = vld [vmem:[#allocation2 + $0x50] sm:$0xff] }
  0x31   :  { %688 = vmatpush3.bf16.msra.mxu0 %v756_v2  ;;  %741 = vmatpush3.bf16.msra.mxu1 %v756_v2  ;;  %v85_v37 = vpack.c.bf16 %v66_v33, %v65_v32  ;;  %v52_v39 = vld [vmem:[#allocation2 + $0x58] sm:$0xff]  ;;  %v67_v40 = vld [vmem:[#allocation2 + $0xd0] sm:$0xff]  ;;  %v53_v42 = vld [vmem:[#allocation2 + $0x60] sm:$0xff] }
  0x32   :  { %689 = vmatprep.subr.bf16.mxu0 %v757_v3  ;;  %734 = vmatprep.subr.bf16.mxu1 %v757_v3  ;;  %v68_v41 = vld [vmem:[#allocation2 + $0xd8] sm:$0xff]  ;;  %v54_v43 = vld [vmem:[#allocation2 + $0x68] sm:$0xff]  ;;  %v69_v44 = vld [vmem:[#allocation2 + $0xe0] sm:$0xff]  ;;  %v78_v46 = vpack.c.bf16 %v52_v39, %v51_v38 }
  0x33   :  { %v70_v45 = vld [vmem:[#allocation2 + $0xe8] sm:$0xff]  ;;  %v86_v47 = vpack.c.bf16 %v68_v41, %v67_v40  ;;  %v79_v48 = vpack.c.bf16 %v54_v43, %v53_v42  ;;  %v55_v50 = vld [vmem:[#allocation2 + $0x70] sm:$0xff]  ;;  %v56_v51 = vld [vmem:[#allocation2 + $0x78] sm:$0xff] }
  0x34   :  { %v87_v49 = vpack.c.bf16 %v70_v45, %v69_v44  ;;  %v71_v52 = vld [vmem:[#allocation2 + $0xf0] sm:$0xff]  ;;  %v72_v53 = vld [vmem:[#allocation2 + $0xf8] sm:$0xff]  ;;  %v80_v54 = vpack.c.bf16 %v56_v51, %v55_v50 }
  0x35   :  { %690 = vmatpush3.bf16.msra.mxu0 %v757_v3  ;;  %742 = vmatpush3.bf16.msra.mxu1 %v757_v3  ;;  %v88_v55 = vpack.c.bf16 %v72_v53, %v71_v52 }
  0x36   :  { %691 = vmatprep.subr.bf16.mxu0 %v758_v10  ;;  %735 = vmatprep.subr.bf16.mxu1 %v758_v10 }
  0x39   :  { %692 = vmatpush3.bf16.msra.mxu0 %v758_v10  ;;  %743 = vmatpush3.bf16.msra.mxu1 %v758_v10 }
  0x3a   :  { %693 = vmatprep.subr.bf16.mxu0 %v759_v11  ;;  %736 = vmatprep.subr.bf16.mxu1 %v759_v11 }
  0x3d   :  { %694 = vmatpush3.bf16.msra.mxu0 %v759_v11  ;;  %744 = vmatpush3.bf16.msra.mxu1 %v759_v11 }
  0x3e   :  { %695 = vmatprep.subr.bf16.mxu0 %v760_v12  ;;  %737 = vmatprep.subr.bf16.mxu1 %v760_v12 }
  0x41   :  { %696 = vmatpush3.bf16.msra.mxu0 %v760_v12  ;;  %745 = vmatpush3.bf16.msra.mxu1 %v760_v12 }
  0x42   :  { %697 = vmatprep.subr.bf16.mxu0 %v761_v13  ;;  %738 = vmatprep.subr.bf16.mxu1 %v761_v13 }
  0x45   :  { %698 = vmatpush3.bf16.msra.mxu0 %v761_v13  ;;  %746 = vmatpush3.bf16.msra.mxu1 %v761_v13 }
  0x48   :  { %700 = vmatmul.mubr.bf16.vlgmr.msra.gmra.mrb[0].mxu0 %v74_v22  ;;  %716 = vmatmul.mubr.bf16.vlgmr.msra.gmra.mrb[0].mxu1 %v82_v23 }
  0x49   :  { %703 = vmatprep.mubr.bf16.mxu0 %v75_v24  ;;  %719 = vmatprep.mubr.bf16.mxu1 %v83_v25 }
  0x50   :  { %704 = vmatmul.mubr.bf16.gmra.mrb[4].mxu0 %v76_v34  ;;  %720 = vmatmul.mubr.bf16.gmra.mrb[4].mxu1 %v84_v35 }
  0x51   :  { %707 = vmatprep.mubr.bf16.mxu0 %v77_v36  ;;  %723 = vmatprep.mubr.bf16.mxu1 %v85_v37 }
  0x58   :  { %708 = vmatmul.mubr.bf16.gmra.mrb[8].mxu0 %v78_v46  ;;  %724 = vmatmul.mubr.bf16.gmra.mrb[8].mxu1 %v86_v47 }
  0x59   :  { %711 = vmatprep.mubr.bf16.mxu0 %v79_v48  ;;  %727 = vmatprep.mubr.bf16.mxu1 %v87_v49 }
  0x60   :  { %712 = vmatmul.mubr.bf16.gmra.mrb[12].mxu0 %v80_v54  ;;  %728 = vmatmul.mubr.bf16.gmra.mrb[12].mxu1 %v88_v55 }
 0x11b   :  { %v701_v56 = vpop.f32.mrb[0].mxu0  ;;  %v717_v57 = vpop.f32.mrb[0].mxu1 }
 0x11c   :  { %v187_v58 = vpop.f32.mrb[1].mxu0  ;;  %v251_v59 = vpop.f32.mrb[1].mxu1 }
 0x11d   :  { %v702_v60 = vpop.f32.mrb[2].mxu0  ;;  %v718_v61 = vpop.f32.mrb[2].mxu1 }
 0x11e   :  { %v572_v62 = vpack.c.bf16 %v702_v60, %v701_v56  ;;  %v612_v63 = vpack.c.bf16 %v718_v61, %v717_v57  ;;  %v190_v0 = vpop.f32.mrb[3].mxu0  ;;  %v254_v1 = vpop.f32.mrb[3].mxu1 }
 0x11f   :  { %v567_v2 = vpack.c.bf16 %v190_v0, %v187_v58  ;;  %v607_v3 = vpack.c.bf16 %v254_v1, %v251_v59 }
 0x120   :  { %644 = vst [vmem:[#allocation7 + $0x8] sm:$0xff] %v572_v62   ;;  %652 = vst [vmem:[#allocation7 + $0x48] sm:$0xff] %v612_v63  }
 0x121   :  { %568 = vst [vmem:[#allocation7] sm:$0xff] %v567_v2   ;;  %651 = vst [vmem:[#allocation7 + $0x40] sm:$0xff] %v607_v3  }
 0x123   :  { %v705_v4 = vpop.f32.mrb[4].mxu0  ;;  %v721_v5 = vpop.f32.mrb[4].mxu1 }
 0x124   :  { %v203_v6 = vpop.f32.mrb[5].mxu0  ;;  %v267_v7 = vpop.f32.mrb[5].mxu1 }
 0x125   :  { %v706_v8 = vpop.f32.mrb[6].mxu0  ;;  %v722_v9 = vpop.f32.mrb[6].mxu1 }
 0x126   :  { %v582_v10 = vpack.c.bf16 %v706_v8, %v705_v4  ;;  %v622_v11 = vpack.c.bf16 %v722_v9, %v721_v5  ;;  %v206_v12 = vpop.f32.mrb[7].mxu0  ;;  %v270_v13 = vpop.f32.mrb[7].mxu1 }
 0x127   :  { %v577_v14 = vpack.c.bf16 %v206_v12, %v203_v6  ;;  %v617_v15 = vpack.c.bf16 %v270_v13, %v267_v7 }
 0x128   :  { %646 = vst [vmem:[#allocation7 + $0x18] sm:$0xff] %v582_v10   ;;  %654 = vst [vmem:[#allocation7 + $0x58] sm:$0xff] %v622_v11  }
 0x129   :  { %645 = vst [vmem:[#allocation7 + $0x10] sm:$0xff] %v577_v14   ;;  %653 = vst [vmem:[#allocation7 + $0x50] sm:$0xff] %v617_v15  }
 0x12b   :  { %v709_v16 = vpop.f32.mrb[8].mxu0  ;;  %v725_v17 = vpop.f32.mrb[8].mxu1 }
 0x12c   :  { %v219_v18 = vpop.f32.mrb[9].mxu0  ;;  %v283_v19 = vpop.f32.mrb[9].mxu1 }
 0x12d   :  { %v710_v20 = vpop.f32.mrb[10].mxu0  ;;  %v726_v21 = vpop.f32.mrb[10].mxu1 }
 0x12e   :  { %v592_v22 = vpack.c.bf16 %v710_v20, %v709_v16  ;;  %v632_v23 = vpack.c.bf16 %v726_v21, %v725_v17  ;;  %v222_v24 = vpop.f32.mrb[11].mxu0  ;;  %v286_v25 = vpop.f32.mrb[11].mxu1 }
 0x12f   :  { %v587_v26 = vpack.c.bf16 %v222_v24, %v219_v18  ;;  %v627_v27 = vpack.c.bf16 %v286_v25, %v283_v19 }
 0x130   :  { %648 = vst [vmem:[#allocation7 + $0x28] sm:$0xff] %v592_v22   ;;  %656 = vst [vmem:[#allocation7 + $0x68] sm:$0xff] %v632_v23  }
 0x131   :  { %647 = vst [vmem:[#allocation7 + $0x20] sm:$0xff] %v587_v26   ;;  %655 = vst [vmem:[#allocation7 + $0x60] sm:$0xff] %v627_v27  }
 0x133   :  { %v713_v28 = vpop.f32.mrb[12].mxu0  ;;  %v729_v29 = vpop.f32.mrb[12].mxu1 }
 0x134   :  { %v235_v30 = vpop.f32.mrb[13].mxu0  ;;  %v299_v31 = vpop.f32.mrb[13].mxu1 }
 0x135   :  { %v714_v32 = vpop.f32.mrb[14].mxu0  ;;  %v730_v33 = vpop.f32.mrb[14].mxu1 }
 0x136   :  { %v602_v34 = vpack.c.bf16 %v714_v32, %v713_v28  ;;  %v642_v35 = vpack.c.bf16 %v730_v33, %v729_v29  ;;  %v238_v36 = vpop.f32.mrb[15].mxu0  ;;  %v302_v37 = vpop.f32.mrb[15].mxu1 }
 0x137   :  { %v597_v38 = vpack.c.bf16 %v238_v36, %v235_v30  ;;  %v637_v39 = vpack.c.bf16 %v302_v37, %v299_v31 }
 0x138   :  { %650 = vst [vmem:[#allocation7 + $0x38] sm:$0xff] %v602_v34   ;;  %658 = vst [vmem:[#allocation7 + $0x78] sm:$0xff] %v642_v35  }
 0x139   :  { %649 = vst [vmem:[#allocation7 + $0x30] sm:$0xff] %v597_v38   ;;  %657 = vst [vmem:[#allocation7 + $0x70] sm:$0xff] %v637_v39  }
 0x13a   :  { %817 = shalt.err (!%p814_p6)
}
 0x13b   :  { %s818_s12 = scalar_lea.hbm %s900_s2, 2048 }
 0x13c   :  { %p819_p7 = scmp.ne.s32.totalorder %s900_s2, %s818_s12  ;;  %p822_p8 = scmp.lt.u32.totalorder %s818_s12, %s900_s2 }
 0x13e   :  { %p824_p9 = pnand %p822_p8, %p819_p7 }
 0x140   :  { %827 = shalt.err (!%p824_p9)
}
 0x141   :  { %485 = dma.vmem_to_hbm [thread:$0]  %s480_s8, 2048, %s900_s2, [#allocation4], %s838_s0, %s838_s0, %s839_s5  }
 0x142   :  { %832 = dma.done.wait [#allocation4], 2048  }
 0x143   :  { %833 = vsyncadd [#allocation4], 4294965248 }
 0x144   :  { %489 = vsyncpa [#allocation3], 1 }
 0x145   :  { %490 = vsyncpa [#allocation6], 1 }
 0x146   :  { %491 = vsyncpa [#allocation4], 1 }

</bundles_post_ra>
